<compile_context>
chip_gen: v7x
topology: tpu7x:2x2x1
jax: 0.10.0
libtpu: 0.0.40
codegen_flags: <defaults>
</compile_context>

<pallas_src>
import functools

import jax
import jax.numpy as jnp
from jax.experimental import pallas as pl
from jax.experimental.pallas import tpu as pltpu

EPS = 1e-5                      # PyTorch BatchNorm1d default eps
MM_DTYPE = jnp.bfloat16         # MXU operand dtype for the big matmuls (f32 accumulation)
ACT_DTYPE = jnp.bfloat16        # storage dtype for the inter-kernel activations h1 / h2
VMEM_LIMIT = 32 * 1024 * 1024   # conservative (v7x-safe); all blocks below are far smaller


def _choose_point_tile(n):
    """Pick a point tile TN and a padded length N_pad (multiple of TN, sublane aligned)."""
    for t in (1024, 512, 256, 128):
        if n % t == 0:
            return t, n
    if n < 128:                               # single (padded) tile, bf16 sublane aligned
        t = ((n + 15) // 16) * 16
        return t, t
    t = 512 if n >= 1024 else 256 if n >= 512 else 128
    return t, ((n + t - 1) // t) * t


def _row_mask(tn, n_valid):
    """(TN, 1) boolean mask of valid (non-pad) rows for the current point tile."""
    row = jax.lax.broadcasted_iota(jnp.int32, (tn, 1), 0) + pl.program_id(1) * tn
    return row < n_valid


# --------------------------------------------------------------------------- kernels
def _conv1_stats_kernel(k, x_ref, w_ref, h_ref, sum_ref, sq_ref):
    """conv1 (tiny K=k -> VPU broadcast FMAs), bf16 store, per-batch BN1 stat partials."""
    @pl.when(pl.program_id(1) == 0)
    def _():
        sum_ref[...] = jnp.zeros_like(sum_ref)
        sq_ref[...] = jnp.zeros_like(sq_ref)

    x = x_ref[0]                              # (TN, k) f32; pad rows are zero
    w = w_ref[...]                            # (k, 64) f32
    h = x[:, 0:1] * w[0:1, :]                 # avoid a K=3 MXU matmul (<7% systolic fill)
    for i in range(1, k):
        h = h + x[:, i:i + 1] * w[i:i + 1, :]

    hq = h.astype(h_ref.dtype)                # bf16 storage
    h_ref[0] = hq
    hf = hq.astype(jnp.float32)               # stats of the values the consumer sees
    sum_ref[0] += jnp.sum(hf, axis=0, keepdims=True)
    sq_ref[0] += jnp.sum(hf * hf, axis=0, keepdims=True)


def _bn_relu_matmul_stats_kernel(tn, n_valid, needs_mask,
                                 h_in_ref, scale_ref, shift_ref, w_ref,
                                 h_out_ref, sum_ref, sq_ref):
    """BN(prev)+ReLU on the tile, bf16 MXU matmul to the next layer, new stat partials."""
    @pl.when(pl.program_id(1) == 0)
    def _():
        sum_ref[...] = jnp.zeros_like(sum_ref)
        sq_ref[...] = jnp.zeros_like(sq_ref)

    a = jnp.maximum(h_in_ref[0].astype(jnp.float32) * scale_ref[...] + shift_ref[...], 0.0)
    if needs_mask:
        a = jnp.where(_row_mask(tn, n_valid), a, 0.0)    # pad rows -> 0 -> zero h rows
    h = jnp.dot(a.astype(MM_DTYPE), w_ref[...], preferred_element_type=jnp.float32)

    hq = h.astype(h_out_ref.dtype)
    h_out_ref[0] = hq
    hf = hq.astype(jnp.float32)
    sum_ref[0] += jnp.sum(hf, axis=0, keepdims=True)
    sq_ref[0] += jnp.sum(hf * hf, axis=0, keepdims=True)


def _conv3_pool_stats_kernel(tn, n_valid, needs_mask,
                             h_in_ref, scale_ref, shift_ref, w_ref,
                             sum_ref, sq_ref, max_ref, min_ref):
    """BN2+ReLU, conv3 matmul, BN3 stat partials and fused per-batch raw max/min pool.

    h3 is never written to HBM: BN3+ReLU is a channel-wise monotone map of h3, so the
    wrapper reconstructs max_n relu(s*h+t) from (max_n h, min_n h) and the sign of s."""
    @pl.when(pl.program_id(1) == 0)
    def _():
        sum_ref[...] = jnp.zeros_like(sum_ref)
        sq_ref[...] = jnp.zeros_like(sq_ref)
        max_ref[...] = jnp.full_like(max_ref, -jnp.inf)
        min_ref[...] = jnp.full_like(min_ref, jnp.inf)

    a = jnp.maximum(h_in_ref[0].astype(jnp.float32) * scale_ref[...] + shift_ref[...], 0.0)
    if needs_mask:
        valid = _row_mask(tn, n_valid)
        a = jnp.where(valid, a, 0.0)
    h = jnp.dot(a.astype(MM_DTYPE), w_ref[...], preferred_element_type=jnp.float32)

    sum_ref[0] += jnp.sum(h, axis=0, keepdims=True)      # pad rows of h are exactly 0
    sq_ref[0] += jnp.sum(h * h, axis=0, keepdims=True)
    if needs_mask:
        hmax = jnp.where(valid, h, -jnp.inf)
        hmin = jnp.where(valid, h, jnp.inf)
    else:
        hmax = hmin = h
    max_ref[0] = jnp.maximum(max_ref[0], jnp.max(hmax, axis=0, keepdims=True))
    min_ref[0] = jnp.minimum(min_ref[0], jnp.min(hmin, axis=0, keepdims=True))


def _fc_head_kernel(p_ref, w4_ref, g4_ref, b4_ref, w5_ref, g5_ref, b5_ref,
                    w6_ref, bias6_ref, out_ref):
    """fc1+BN4+ReLU, fc2+BN5+ReLU, fc3+bias on the small (B, 1024) pooled tensor."""
    def bn_relu(h, g_ref, b_ref):
        mean = jnp.mean(h, axis=0, keepdims=True)
        var = jnp.maximum(jnp.mean(h * h, axis=0, keepdims=True) - mean * mean, 0.0)
        scale = g_ref[...] * jax.lax.rsqrt(var + EPS)
        return jnp.maximum(h * scale + (b_ref[...] - mean * scale), 0.0)

    h = jnp.dot(p_ref[...].astype(MM_DTYPE), w4_ref[...],
                preferred_element_type=jnp.float32)                    # (B, 512)
    h = bn_relu(h, g4_ref, b4_ref)
    h = jnp.dot(h.astype(MM_DTYPE), w5_ref[...],
                preferred_element_type=jnp.float32)                    # (B, 256)
    h = bn_relu(h, g5_ref, b5_ref)
    out_ref[...] = jnp.dot(h.astype(MM_DTYPE), w6_ref[...],
                           preferred_element_type=jnp.float32) + bias6_ref[...]


# --------------------------------------------------------------------------- wrapper
def _bn_fold(sum_b, sq_b, gamma, beta, count):
    """Fold training-mode BN into per-channel (scale, shift) from per-batch partials."""
    s = jnp.sum(sum_b, axis=0)                           # (1, C)
    q = jnp.sum(sq_b, axis=0)
    mean = s / count
    var = jnp.maximum(q / count - mean * mean, 0.0)
    scale = gamma * jax.lax.rsqrt(var + EPS)
    shift = beta - mean * scale
    return scale, shift


def tnet_forward(x, params, k):
    B, k_in, N = x.shape
    assert k_in == k
    f32 = jnp.float32
    (w1, b1, g1, be1, w2, b2, g2, be2, w3, b3, g3, be3,
     w4, b4, g4, be4, w5, b5, g5, be5, w6, b6) = params
    # b1..b5 are intentionally unused: pre-BN per-channel biases are cancelled by BN.

    TN, N_pad = _choose_point_tile(N)
    nN = N_pad // TN
    needs_mask = N_pad != N
    count = float(B * N)

    # TODO(synk): read x in its native (B, k, N) layout (k-wide in-kernel transpose) to
    #             avoid materializing this transposed copy; minor (x and h1 are small).
    x3 = jnp.transpose(x, (0, 2, 1)).astype(f32)         # NCW -> (B, N, k)
    if needs_mask:
        x3 = jnp.pad(x3, ((0, 0), (0, N_pad - N), (0, 0)))

    def act_spec(c):
        return pl.BlockSpec((1, TN, c), lambda b, n: (b, n, 0))

    def stat_spec(c):
        return pl.BlockSpec((1, 1, c), lambda b, n: (b, 0, 0))

    def rep_spec(shape):
        nd = len(shape)
        return pl.BlockSpec(shape, lambda b, n, _nd=nd: (0,) * _nd)

    # Per-batch accumulators -> the batch axis can be "parallel" (megacore-safe).
    cp_conv = pltpu.CompilerParams(dimension_semantics=("parallel", "arbitrary"),
                                   vmem_limit_bytes=VMEM_LIMIT)

    # ---- conv1 (+ BN1 stat partials) ----------------------------------------
    h1, s1, q1 = pl.pallas_call(
        functools.partial(_conv1_stats_kernel, k),
        grid=(B, nN),
        in_specs=[act_spec(k), rep_spec(w1.shape)],
        out_specs=(act_spec(64), stat_spec(64), stat_spec(64)),
        out_shape=(jax.ShapeDtypeStruct((B, N_pad, 64), ACT_DTYPE),
                   jax.ShapeDtypeStruct((B, 1, 64), f32),
                   jax.ShapeDtypeStruct((B, 1, 64), f32)),
        compiler_params=cp_conv,
    )(x3, w1)
    scale1, shift1 = _bn_fold(s1, q1, g1, be1, count)

    # ---- BN1+ReLU -> conv2 (+ BN2 stat partials) ----------------------------
    h2, s2, q2 = pl.pallas_call(
        functools.partial(_bn_relu_matmul_stats_kernel, TN, N, needs_mask),
        grid=(B, nN),
        in_specs=[act_spec(64), rep_spec((1, 64)), rep_spec((1, 64)),
                  rep_spec((64, 128))],
        out_specs=(act_spec(128), stat_spec(128), stat_spec(128)),
        out_shape=(jax.ShapeDtypeStruct((B, N_pad, 128), ACT_DTYPE),
                   jax.ShapeDtypeStruct((B, 1, 128), f32),
                   jax.ShapeDtypeStruct((B, 1, 128), f32)),
        compiler_params=cp_conv,
    )(h1, scale1, shift1, w2.astype(MM_DTYPE))
    scale2, shift2 = _bn_fold(s2, q2, g2, be2, count)

    # ---- BN2+ReLU -> conv3 fused with BN3 stats + raw max/min pool (no h3) ---
    s3, q3, hmax, hmin = pl.pallas_call(
        functools.partial(_conv3_pool_stats_kernel, TN, N, needs_mask),
        grid=(B, nN),
        in_specs=[act_spec(128), rep_spec((1, 128)), rep_spec((1, 128)),
                  rep_spec((128, 1024))],
        out_specs=(stat_spec(1024), stat_spec(1024), stat_spec(1024), stat_spec(1024)),
        out_shape=(jax.ShapeDtypeStruct((B, 1, 1024), f32),) * 4,
        compiler_params=cp_conv,
    )(h2, scale2, shift2, w3.astype(MM_DTYPE))

    # BN3+ReLU applied to the pooled values (monotone per channel: pick max/min by sign).
    scale3, shift3 = _bn_fold(s3, q3, g3, be3, count)
    pooled_raw = jnp.where(scale3 >= 0, hmax[:, 0, :], hmin[:, 0, :])   # (B, 1024)
    pooled = jnp.maximum(pooled_raw * scale3 + shift3, 0.0)

    # ---- FC head (small); fc3 output padded to a lane-dense 128 lanes --------
    out_pad = max(128, ((k * k + 127) // 128) * 128)
    w6p = jnp.pad(w6, ((0, 0), (0, out_pad - k * k))).astype(MM_DTYPE)
    b6p = jnp.pad(b6, ((0, 0), (0, out_pad - k * k)))
    vmem = pl.BlockSpec(memory_space=pltpu.MemorySpace.VMEM)
    fc_out = pl.pallas_call(
        _fc_head_kernel,
        out_shape=jax.ShapeDtypeStruct((B, out_pad), f32),
        in_specs=[vmem] * 9,
        out_specs=vmem,
        compiler_params=pltpu.CompilerParams(vmem_limit_bytes=VMEM_LIMIT),
    )(pooled, w4.astype(MM_DTYPE), g4, be4, w5.astype(MM_DTYPE), g5, be5, w6p, b6p)

    # + identity and reshape in the wrapper (tiny)
    out = fc_out[:, :k * k] + jnp.eye(k, dtype=f32).reshape(1, k * k)
    return out.reshape(B, k, k)


# --------------------------------------------------------------------------- helpers
def init_params(key, k):
    """Deterministic PyTorch-style init (U(-1/sqrt(fan_in), .)); BN gamma=1, beta=0."""
    layer_dims = [(k, 64), (64, 128), (128, 1024), (1024, 512), (512, 256), (256, k * k)]
    keys = jax.random.split(key, len(layer_dims))
    params = []
    for i, (cin, cout) in enumerate(layer_dims):
        kw, kb = jax.random.split(keys[i])
        bound = 1.0 / (cin ** 0.5)
        w = jax.random.uniform(kw, (cin, cout), jnp.float32, -bound, bound)
        b = jax.random.uniform(kb, (1, cout), jnp.float32, -bound, bound)
        params += [w, b]
        if i < 5:  # layers followed by BatchNorm (conv1-3, fc1-2)
            params += [jnp.ones((1, cout), jnp.float32), jnp.zeros((1, cout), jnp.float32)]
    return tuple(params)


def tnet_ref(x, params, k, mm_dtype=MM_DTYPE, act_dtype=ACT_DTYPE):
    """Pure-JAX reference mirroring the PyTorch forward (training-mode BN, with biases).

    To isolate kernel-logic correctness it mirrors the kernel's precision policy: bf16
    operands for the big matmuls (f32 accumulation) and bf16 rounding of the conv1/conv2
    outputs at the point the kernel stores them (the bias-free linear output — the bias
    itself is algebraically cancelled by BN either way).  BN statistics, pooling and the
    FC head follow the PyTorch module exactly.
    """
    B, _, N = x.shape
    (w1, b1, g1, be1, w2, b2, g2, be2, w3, b3, g3, be3,
     w4, b4, g4, be4, w5, b5, g5, be5, w6, b6) = params
    hp = jax.lax.Precision.HIGHEST

    def mm(a, w):
        return jnp.dot(a.astype(mm_dtype), w.astype(mm_dtype),
                       preferred_element_type=jnp.float32)

    def bnrelu(h, g, b):
        m = jnp.mean(h, axis=0, keepdims=True)
        v = jnp.mean((h - m) ** 2, axis=0, keepdims=True)
        return jnp.maximum((h - m) * jax.lax.rsqrt(v + EPS) * g + b, 0.0)

    def store(h):  # inter-kernel activation storage rounding (mirrors ACT_DTYPE)
        return h.astype(act_dtype).astype(jnp.float32)

    h = jnp.transpose(x, (0, 2, 1)).reshape(B * N, k).astype(jnp.float32)
    h = bnrelu(store(jnp.dot(h, w1, precision=hp)) + b1, g1, be1)
    h = bnrelu(store(mm(h, w2)) + b2, g2, be2)
    h = bnrelu(mm(h, w3) + b3, g3, be3)               # h3 is never stored by the kernel
    h = jnp.max(h.reshape(B, N, -1), axis=1)
    h = bnrelu(mm(h, w4) + b4, g4, be4)
    h = bnrelu(mm(h, w5) + b5, g5, be5)
    h = mm(h, w6) + b6
    h = h + jnp.eye(k, dtype=jnp.float32).reshape(1, k * k)
    return h.reshape(B, k, k)


if __name__ == "__main__":
    k, B = 3, 2
    key = jax.random.PRNGKey(0)
    kx1, kx2, kp = jax.random.split(key, 3)
    params = init_params(kp, k)

    # Case 1: N divisible by the tile (no padding / masking).
    N1 = 16
    x1 = jax.random.normal(kx1, (B, k, N1), jnp.float32)   # PyTorch layout (B, k, N)
    out1 = jax.block_until_ready(tnet_forward(x1, params, k))
    ref1 = tnet_ref(x1, params, k)
    assert out1.shape == (B, k, k), out1.shape
    assert jnp.allclose(out1, ref1, rtol=2e-2, atol=2e-2), (
        f"max abs err {jnp.max(jnp.abs(out1 - ref1))}")

    # Case 2: ragged N (exercises the padded / masked-tile path).
    N2 = 20
    x2 = jax.random.normal(kx2, (B, k, N2), jnp.float32)
    out2 = jax.block_until_ready(tnet_forward(x2, params, k))
    ref2 = tnet_ref(x2, params, k)
    assert out2.shape == (B, k, k), out2.shape
    assert jnp.allclose(out2, ref2, rtol=2e-2, atol=2e-2), (
        f"max abs err {jnp.max(jnp.abs(out2 - ref2))}")

    print("KERNEL_OK")
</pallas_src>

<mosaic_0001>
module attributes {stable_mosaic.version = 11 : i64} {
  func.func @_conv1_stats_kernel(%arg0: i32, %arg1: i32, %arg2: memref<1x16x3xf32, #tpu.memory_space<vmem>>, %arg3: memref<3x64xf32, #tpu.memory_space<vmem>>, %arg4: memref<1x16x64xbf16, #tpu.memory_space<vmem>>, %arg5: memref<1x1x64xf32, #tpu.memory_space<vmem>>, %arg6: memref<1x1x64xf32, #tpu.memory_space<vmem>>) attributes {dimension_semantics = [#tpu.dimension_semantics<parallel>, #tpu.dimension_semantics<arbitrary>], iteration_bounds = array<i64: 2, 1>, scalar_prefetch = 0 : i64, scratch_operands = 0 : i64, tpu.core_type = #tpu.core_type<tc>, window_params = [{transform_indices = @transform_0, window_bounds = array<i64: 1, 16, 3>}, {pipeline_mode = #tpu.pipeline_mode<synchronous>, transform_indices = @transform_1, window_bounds = array<i64: 3, 64>}, {transform_indices = @transform_2, window_bounds = array<i64: 1, 16, 64>}, {transform_indices = @transform_3, window_bounds = array<i64: 1, 1, 64>}, {transform_indices = @transform_4, window_bounds = array<i64: 1, 1, 64>}]} {
    %c0_i32 = arith.constant 0 : i32
    %0 = arith.cmpi eq, %arg1, %c0_i32 : i32
    %1 = arith.extui %0 : i1 to i32
    %c0_i32_0 = arith.constant 0 : i32
    %2 = arith.cmpi ne, %1, %c0_i32_0 : i32
    scf.if %2 {
      %cst_21 = arith.constant 0.000000e+00 : f32
      %45 = vector.broadcast %cst_21 : f32 to vector<1x1x64xf32>
      %c0_22 = arith.constant 0 : index
      %c0_23 = arith.constant 0 : index
      %c0_24 = arith.constant 0 : index
      %46 = vector.load %arg5[%c0_22, %c0_23, %c0_24] : memref<1x1x64xf32, #tpu.memory_space<vmem>>, vector<1x1x64xf32>
      tpu.vector_store %arg5[%c0_22, %c0_23, %c0_24], %45 {strides = array<i32>} : memref<1x1x64xf32, #tpu.memory_space<vmem>>, vector<1x1x64xf32>,
      %cst_25 = arith.constant 0.000000e+00 : f32
      %47 = vector.broadcast %cst_25 : f32 to vector<1x1x64xf32>
      %c0_26 = arith.constant 0 : index
      %c0_27 = arith.constant 0 : index
      %c0_28 = arith.constant 0 : index
      %48 = vector.load %arg6[%c0_26, %c0_27, %c0_28] : memref<1x1x64xf32, #tpu.memory_space<vmem>>, vector<1x1x64xf32>
      tpu.vector_store %arg6[%c0_26, %c0_27, %c0_28], %47 {strides = array<i32>} : memref<1x1x64xf32, #tpu.memory_space<vmem>>, vector<1x1x64xf32>,
    } else {
    }
    %c0 = arith.constant 0 : index
    %c0_1 = arith.constant 0 : index
    %c0_2 = arith.constant 0 : index
    %3 = vector.load %arg2[%c0, %c0_1, %c0_2] : memref<1x16x3xf32, #tpu.memory_space<vmem>>, vector<1x16x3xf32>
    %4 = vector.shape_cast %3 : vector<1x16x3xf32> to vector<16x3xf32>
    %c0_3 = arith.constant 0 : index
    %c0_4 = arith.constant 0 : index
    %5 = vector.load %arg3[%c0_3, %c0_4] : memref<3x64xf32, #tpu.memory_space<vmem>>, vector<3x64xf32>
    %6 = vector.extract_strided_slice %4 {offsets = [0, 0], sizes = [16, 1], strides = [1, 1]} : vector<16x3xf32> to vector<16x1xf32>
    %7 = vector.extract_strided_slice %5 {offsets = [0, 0], sizes = [1, 64], strides = [1, 1]} : vector<3x64xf32> to vector<1x64xf32>
    %8 = vector.broadcast %6 : vector<16x1xf32> to vector<16x64xf32>
    %9 = vector.broadcast %7 : vector<1x64xf32> to vector<16x64xf32>
    %10 = arith.mulf %8, %9 : vector<16x64xf32>
    %11 = vector.extract_strided_slice %4 {offsets = [0, 1], sizes = [16, 1], strides = [1, 1]} : vector<16x3xf32> to vector<16x1xf32>
    %12 = vector.extract_strided_slice %5 {offsets = [1, 0], sizes = [1, 64], strides = [1, 1]} : vector<3x64xf32> to vector<1x64xf32>
    %13 = vector.broadcast %11 : vector<16x1xf32> to vector<16x64xf32>
    %14 = vector.broadcast %12 : vector<1x64xf32> to vector<16x64xf32>
    %15 = arith.mulf %13, %14 : vector<16x64xf32>
    %16 = arith.addf %10, %15 : vector<16x64xf32>
    %17 = vector.extract_strided_slice %4 {offsets = [0, 2], sizes = [16, 1], strides = [1, 1]} : vector<16x3xf32> to vector<16x1xf32>
    %18 = vector.extract_strided_slice %5 {offsets = [2, 0], sizes = [1, 64], strides = [1, 1]} : vector<3x64xf32> to vector<1x64xf32>
    %19 = vector.broadcast %17 : vector<16x1xf32> to vector<16x64xf32>
    %20 = vector.broadcast %18 : vector<1x64xf32> to vector<16x64xf32>
    %21 = arith.mulf %19, %20 : vector<16x64xf32>
    %22 = arith.addf %16, %21 : vector<16x64xf32>
    %23 = arith.truncf %22 : vector<16x64xf32> to vector<16x64xbf16>
    %c0_5 = arith.constant 0 : index
    %c0_6 = arith.constant 0 : index
    %c0_7 = arith.constant 0 : index
    %24 = vector.load %arg4[%c0_5, %c0_6, %c0_7] : memref<1x16x64xbf16, #tpu.memory_space<vmem>>, vector<1x16x64xbf16>
    %25 = vector.shape_cast %24 : vector<1x16x64xbf16> to vector<16x64xbf16>
    %26 = vector.shape_cast %23 : vector<16x64xbf16> to vector<1x16x64xbf16>
    tpu.vector_store %arg4[%c0_5, %c0_6, %c0_7], %26 {strides = array<i32>} : memref<1x16x64xbf16, #tpu.memory_space<vmem>>, vector<1x16x64xbf16>,
    %27 = arith.extf %23 : vector<16x64xbf16> to vector<16x64xf32>
    %c0_8 = arith.constant 0 : index
    %c0_9 = arith.constant 0 : index
    %c0_10 = arith.constant 0 : index
    %28 = vector.load %arg5[%c0_8, %c0_9, %c0_10] : memref<1x1x64xf32, #tpu.memory_space<vmem>>, vector<1x1x64xf32>
    %29 = vector.shape_cast %28 : vector<1x1x64xf32> to vector<1x64xf32>
    %cst = arith.constant dense<0.000000e+00> : vector<64xf32>
    %30 = vector.multi_reduction <add>, %27, %cst [0] : vector<16x64xf32> to vector<64xf32>
    %31 = vector.shape_cast %30 : vector<64xf32> to vector<1x64xf32>
    %32 = arith.addf %29, %31 : vector<1x64xf32>
    %c0_11 = arith.constant 0 : index
    %c0_12 = arith.constant 0 : index
    %c0_13 = arith.constant 0 : index
    %33 = vector.load %arg5[%c0_11, %c0_12, %c0_13] : memref<1x1x64xf32, #tpu.memory_space<vmem>>, vector<1x1x64xf32>
    %34 = vector.shape_cast %33 : vector<1x1x64xf32> to vector<1x64xf32>
    %35 = vector.shape_cast %32 : vector<1x64xf32> to vector<1x1x64xf32>
    tpu.vector_store %arg5[%c0_11, %c0_12, %c0_13], %35 {strides = array<i32>} : memref<1x1x64xf32, #tpu.memory_space<vmem>>, vector<1x1x64xf32>,
    %c0_14 = arith.constant 0 : index
    %c0_15 = arith.constant 0 : index
    %c0_16 = arith.constant 0 : index
    %36 = vector.load %arg6[%c0_14, %c0_15, %c0_16] : memref<1x1x64xf32, #tpu.memory_space<vmem>>, vector<1x1x64xf32>
    %37 = vector.shape_cast %36 : vector<1x1x64xf32> to vector<1x64xf32>
    %38 = arith.mulf %27, %27 : vector<16x64xf32>
    %cst_17 = arith.constant dense<0.000000e+00> : vector<64xf32>
    %39 = vector.multi_reduction <add>, %38, %cst_17 [0] : vector<16x64xf32> to vector<64xf32>
    %40 = vector.shape_cast %39 : vector<64xf32> to vector<1x64xf32>
    %41 = arith.addf %37, %40 : vector<1x64xf32>
    %c0_18 = arith.constant 0 : index
    %c0_19 = arith.constant 0 : index
    %c0_20 = arith.constant 0 : index
    %42 = vector.load %arg6[%c0_18, %c0_19, %c0_20] : memref<1x1x64xf32, #tpu.memory_space<vmem>>, vector<1x1x64xf32>
    %43 = vector.shape_cast %42 : vector<1x1x64xf32> to vector<1x64xf32>
    %44 = vector.shape_cast %41 : vector<1x64xf32> to vector<1x1x64xf32>
    tpu.vector_store %arg6[%c0_18, %c0_19, %c0_20], %44 {strides = array<i32>} : memref<1x1x64xf32, #tpu.memory_space<vmem>>, vector<1x1x64xf32>,
    return
  }
  func.func @transform_0(%arg0: i32, %arg1: i32) -> (i32, i32, i32) {
    %c0_i32 = arith.constant 0 : i32
    %c0_i32_0 = arith.constant 0 : i32
    return %arg0, %arg1, %c0_i32 : i32, i32, i32
  }
  func.func @transform_1(%arg0: i32, %arg1: i32) -> (i32, i32) {
    %c0_i32 = arith.constant 0 : i32
    %c0_i32_0 = arith.constant 0 : i32
    %c0_i32_1 = arith.constant 0 : i32
    return %c0_i32, %c0_i32_0 : i32, i32
  }
  func.func @transform_2(%arg0: i32, %arg1: i32) -> (i32, i32, i32) {
    %c0_i32 = arith.constant 0 : i32
    %c0_i32_0 = arith.constant 0 : i32
    return %arg0, %arg1, %c0_i32 : i32, i32, i32
  }
  func.func @transform_3(%arg0: i32, %arg1: i32) -> (i32, i32, i32) {
    %c0_i32 = arith.constant 0 : i32
    %c0_i32_0 = arith.constant 0 : i32
    %c0_i32_1 = arith.constant 0 : i32
    return %arg0, %c0_i32, %c0_i32_0 : i32, i32, i32
  }
  func.func @transform_4(%arg0: i32, %arg1: i32) -> (i32, i32, i32) {
    %c0_i32 = arith.constant 0 : i32
    %c0_i32_0 = arith.constant 0 : i32
    %c0_i32_1 = arith.constant 0 : i32
    return %arg0, %c0_i32, %c0_i32_0 : i32, i32, i32
  }
}

</mosaic_0001>

<bundles_post_ra>
// kernel: tpu_custom_call.1
= control target key start
LH: loop header
LB: loop body
LE: loop exit
PB: predicated region body
PF: predicated region fallthrough
CT: control target
= control target key end

     0   :  { %10 = vsyncpa [#allocation3], 0  ;;  %s1009_s0 = inlined_call_operand.vmem [shape: f32[2,16,3], index: 0, kind: input, shape index: {}]   ;;  %s1010_s1 = inlined_call_operand.vmem [shape: f32[3,64], index: 1, kind: input, shape index: {}]   ;;  %s1011_s2 = inlined_call_operand.hbm [shape: bf16[2,16,64], index: 2, kind: output, shape index: {0}]   ;;  %s1012_s3 = inlined_call_operand.hbm [shape: f32[2,1,64], index: 3, kind: output, shape index: {1}]   ;;  %s1013_s4 = inlined_call_operand.hbm [shape: f32[2,1,64], index: 4, kind: output, shape index: {2}]  }
   0x1   :  { %12 = vsyncpa [#allocation3 + $0x1], 0 }
   0x2   :  { %13 = vsyncpa [#allocation5], 0 }
   0x3   :  { %15 = vsyncpa [#allocation5 + $0x1], 0  ;;  %s794_s15 = smov 0   ;;  %s796_s16 = smov 0  }
   0x4   :  { %s798_s17 = smov 0   ;;  %s800_s18 = smov 0  }
   0x5   :  { %s802_s19 = smov 0   ;;  %s804_s20 = smov 0  }
   0x6 LB: > { %s524_s21 = sadd.s32 4294967295, %s758_s20   ;;  %s525_s22 = sadd.s32 4294967294, %s758_s20   ;;  %s758_s20 = sphi %s804_s20, %s21_s20   ;;  %s754_s19 = sphi %s802_s19, %s1020_s19   ;;  %s750_s18 = sphi %s800_s18, %s1019_s18   ;;  %s746_s17 = sphi %s798_s17, %s1018_s17   ;;  %s742_s16 = sphi %s796_s16, %s1017_s16   ;;  %s738_s15 = sphi %s794_s15, %s1016_s15  }
   0x7   : > { %s33_s23 = sadd.s32 1, %s754_s19  ;;  %s91_s24 = sadd.s32 1, %s746_s17 }
   0x8   : > { %p35_p0 = scmp.ge.s32.totalorder %s33_s23, 2  ;;  %p101_p1 = scmp.ne.s32.totalorder %s746_s17, %s742_s16 }
   0x9   : > { %p102_p2 = scmp.eq.s32.totalorder %s524_s21, 1  ;;  %p107_p3 = scmp.ne.s32.totalorder %s742_s16, %s738_s15 }
   0xa   : > { %s1022_s23 = smov (%p35_p0, %s33_s23), 0  ;;  %p108_p5 = scmp.eq.s32.totalorder %s525_s22, 1 }
   0xb   : > { %p836_p4 = por %p102_p2, %p101_p1  ;;  %s86_s26 = ssub.s32 %s754_s19, %s1022_s23 }
   0xc   : > { %p528_p6 = scmp.ge.s32.totalorder %s758_s20, 1  ;;  %p89_p7 = scmp.eq.s32.totalorder %s86_s26, 0 }
   0xd   : > { %p845_p8 = por %p108_p5, %p107_p3  ;;  %p194_p9 = scmp.lt.s32.totalorder %s758_s20, 3 }
   0xe   : > { %s851_s28 = scalar_select %p89_p7, %s746_s17, %s91_s24  }
   0xf   : > { %p195_p10 = pnand %p528_p6, %p194_p9 }
  0x10   : > { %p233_p11 = scmp.lt.s32.totalorder (!%p195_p10), %s750_s18, 1  ;;  %v760_v0 = vmov (!%p195_p10), 1   ;;  %v761_v1 = vmov (!%p195_p10), 0   ;;  %v762_v4 = vmov (!%p195_p10), 2   ;;  %s859_s8 = sand.u32 (!%p195_p10), 1, %s742_s16   ;;  %vm247_vm0 = vcmask (!%p195_p10), 516096  }
  0x11   : > { %198 = sbr.rel (%p195_p10) target bundleno = 238 (0xee), region = 28  ;;  %617 = vset.pattern.permute.xlu1 (!%p195_p10), %v760_v0  ;;  %616 = vset.pattern.permute.xlu0 (!%p195_p10), %v761_v1  ;;  %s862_s9 = scalar_lea.vmem (!%p195_p10), [#allocation4], %s859_s8  ;;  %v763_v5 = vmov (!%p195_p10), 0.0   ;;  %v263_v6 = vlaneseq (!%p195_p10)  ;;  %v252_v10 = vld [vmem:[%s1010_s1] sm:$0x7] (!%p195_p10)  ;;  %vm309_vm1 = vcmask (!%p195_p10), 519168  }
  0x12   : > { %248 = vst.msk [vmem:[%s862_s9] sm:$0x1] (!%p195_p10), %vm247_vm0, %v763_v5  ;;  %s867_s10 = scalar_lea.vmem (!%p195_p10), [#allocation6], %s859_s8  ;;  %s529_s13 = sshll.u32 (!%p195_p10), %s859_s8, 3  ;;  %vm315_vm2 = vcmask (!%p195_p10), 523264  }
  0x13   : > { %249 = vst.msk [vmem:[%s867_s10] sm:$0x1] (!%p195_p10), %vm247_vm0, %v763_v5  ;;  %v264_v7 = vshrl.u32 (!%p195_p10), %v263_v6, 7  ;;  %s544_s14 = sshll.u32 (!%p195_p10), %s750_s18, 7  ;;  %s219_s24 = scalar_lea.vmem (!%p195_p10), [#allocation2], %s529_s13 }
  0x14   : > { %s366_s26 = sshll.u32 (!%p195_p10), %s219_s24, 4  ;;  %s879_s5 = scalar_lea.hbm (!%p195_p10), %s1011_s2, %s544_s14  ;;  %s881_s26 = int_to_ptr.vmem [resolvable:$true] %s366_s26 }
  0x15   : > { %v279_v8 = vsub.s32 (!%p195_p10), 1, %v264_v7  ;;  %v265_v9 = vsub.s32 (!%p195_p10), 0, %v264_v7  ;;  %v295_v13 = vsub.s32 (!%p195_p10), 2, %v264_v7  ;;  %s343_s6 = scalar_lea.sflag (!%p195_p10), [#allocation3], %s859_s8  ;;  %s764_s11 = smov (!%p195_p10), [#allocation2]  }
  0x16   : > { %s624_s12 = sshll.u32 (!%p195_p10), %s764_s11, 4  ;;  %s625_s12 = int_to_ptr.vmem [resolvable:$false] %s624_s12 }
  0x17   : > { %v280_v14 = vrot.slane (!%p195_p10), %v252_v10, %v279_v8  ;;  %v266_v15 = vrot.slane (!%p195_p10), %v252_v10, %v265_v9  ;;  %v296_v18 = vrot.slane (!%p195_p10), %v252_v10, %v295_v13  ;;  %s626_s13 = scalar_lea.vmem (!%p195_p10), %s625_s12, 256  ;;  %p627_p1 = scmp.lt.s32.totalorder (!%p195_p10), %s881_s26, %s625_s12 }
  0x18   : > { %s234_s29 = scalar_select %p233_p11, %s750_s18, 1 }
  0x1a   : > { %s541_s30 = sshll.u32 %s234_s29, 4 }
  0x1b   : > { %s240_s7 = scalar_lea.vmem %s1009_s0, %s541_s30 }
  0x1c   : > { %v250_v2 = vld [vmem:[%s240_s7] sm:$0xff]  ;;  %v251_v3 = vld [vmem:[%s240_s7 + $0x8] sm:$0xff]  ;;  %s620_s7 = scalar_lea.vmem %s881_s26, 128 }
  0x1d   : > { %270 = vperm.xlu1 %617, %v250_v2   ;;  %255 = vperm.xlu0 %616, %v250_v2   ;;  %p621_p12 = scmp.ne.s32.totalorder %s881_s26, %s620_s7  ;;  %p628_p2 = scmp.lt.s32.totalorder %s626_s13, %s620_s7 }
  0x1f   : > { %p622_p13 = pnand %p621_p12, %p836_p4  ;;  %p629_p3 = por %p628_p2, %p627_p1 }
  0x21   : > { %274 = vperm.xlu1 %617, %v251_v3   ;;  %260 = vperm.xlu0 %616, %v251_v3   ;;  %p623_p0 = pneg %p622_p13 }
  0x23   : > { %p630_p5 = pnand %p629_p3, %p623_p0 }
  0x25   : > { %619 = vset.pattern.permute.xlu1 %v762_v4  ;;  %618 = vset.pattern.permute.xlu0 %v762_v4 }
  0x26   : > { %290 = vperm.xlu1 %619, %v251_v3   ;;  %286 = vperm.xlu0 %618, %v250_v2  }
  0x9c   : > { %v271_v11 = vpop.permute.xlu1 %270  ;;  %v256_v12 = vpop.permute.xlu0 %255 }
  0x9d   : > { %v281_v19 = vmul.f32 %v280_v14, %v271_v11  ;;  %v267_v20 = vmul.f32 %v266_v15, %v256_v12 }
  0x9f   : > { %v283_v25 = vadd.f32 %v281_v19, %v267_v20 }
  0xa0   : > { %v275_v16 = vpop.permute.xlu1 %274  ;;  %v261_v17 = vpop.permute.xlu0 %260 }
  0xa1   : > { %v282_v21 = vmul.f32 %v280_v14, %v275_v16  ;;  %v268_v22 = vmul.f32 %v266_v15, %v261_v17 }
  0xa3   : > { %v284_v26 = vadd.f32 %v282_v21, %v268_v22 }
  0xa5   : > { %v291_v23 = vpop.permute.xlu1 %290  ;;  %v287_v24 = vpop.permute.xlu0 %286 }
  0xa6   : > { %v298_v27 = vmul.f32 %v296_v18, %v291_v23  ;;  %v297_v28 = vmul.f32 %v296_v18, %v287_v24 }
  0xa8   : > { %v300_v29 = vadd.f32 %v298_v27, %v284_v26  ;;  %v299_v30 = vadd.f32 %v297_v28, %v283_v25 }
  0xaa   : > { %v543_v31 = vpack.c.bf16 %v300_v29, %v300_v29  ;;  %v301_v32 = vpack.c.bf16 %v300_v29, %v299_v30  ;;  %v542_v33 = vpack.c.bf16 %v299_v30, %v299_v30 }
  0xac   : > { %311 = vst.msk [vmem:[%s219_s24 + $0x4] sm:$0xf] %vm309_vm1, %v543_v31  ;;  %310 = vst.msk [vmem:[%s219_s24] sm:$0xf] %vm309_vm1, %v542_v33  ;;  %v312_v34 = vunpack.c.l.bf16 %v301_v32  ;;  %v313_v35 = vunpack.c.h.bf16 %v301_v32 }
  0xad   : > { %633 = shalt.err (!%p630_p5)
}
  0xae   : > { %s634_s14 = scalar_lea.hbm %s879_s5, 128  ;;  %s638_s30 = scalar_lea.hbm %s1011_s2, 256 }
  0xaf   : > { %p635_p6 = scmp.ne.s32.totalorder %s879_s5, %s634_s14  ;;  %p639_p10 = scmp.lt.u32.totalorder %s879_s5, %s1011_s2 }
  0xb0   : > { %p640_p11 = scmp.lt.u32.totalorder %s638_s30, %s634_s14  ;;  %p642_p13 = scmp.lt.u32.totalorder %s634_s14, %s879_s5 }
  0xb1   : > { %p636_p7 = pnand %p635_p6, %p836_p4 }
  0xb2   : > { %p641_p12 = por %p640_p11, %p639_p10 }
  0xb3   : > { %p637_p9 = pneg %p636_p7 }
  0xb4   : > { %p643_p0 = por %p642_p13, %p641_p12 }
  0xb6   : > { %p644_p1 = pnand %p643_p0, %p637_p9 }
  0xb8   : > { %647 = shalt.err (!%p644_p1)
}
  0xb9   : > { %s765_s7 = smov 64   ;;  %s766_s13 = smov 4   ;;  %v316_v36 = vsel %vm315_vm2, %v312_v34, 0.0  ;;  %v317_v37 = vsel %vm315_vm2, %v313_v35, 0.0  ;;  %v329_v38 = vmul.f32 %v312_v34, %v312_v34  ;;  %v330_v39 = vmul.f32 %v313_v35, %v313_v35  ;;  %v314_v53 = vld [vmem:[%s862_s9] sm:$0x1] }
  0xba   : > { %545 = dma.vmem_to_hbm [thread:$0]  (%p836_p4), %s881_s26, 128, %s879_s5, %s343_s6, %s765_s7, %s765_s7, %s766_s13   ;;  %v318_v40 = vadd.f32 %v317_v37, %v316_v36 }
  0xbb   : > { %v331_v41 = vsel %vm315_vm2, %v329_v38, 0.0  ;;  %v332_v42 = vsel %vm315_vm2, %v330_v39, 0.0  ;;  %s913_s8 = sand.u32 1, %s524_s21   ;;  %s537_s26 = sshll.u32 %s750_s18, 4  ;;  %v328_v56 = vld [vmem:[%s867_s10] sm:$0x1] }
  0xbc   : > { %v319_v43 = vrot.slane %v318_v40, 4  ;;  %v333_v44 = vadd.f32 %v332_v42, %v331_v41  ;;  %s382_s5 = sshll.u32 %s862_s9, 4  ;;  %s395_s6 = sshll.u32 %s867_s10, 4  ;;  %s925_s5 = int_to_ptr.vmem [resolvable:$true] %s382_s5  ;;  %s934_s6 = int_to_ptr.vmem [resolvable:$true] %s395_s6 }
  0xbd   : > { %s923_s29 = scalar_lea.hbm %s1012_s3, %s537_s26  ;;  %s932_s30 = scalar_lea.hbm %s1013_s4, %s537_s26 }
  0xbe   : > { %v320_v45 = vadd.f32 %v319_v43, %v318_v40  ;;  %v334_v46 = vrot.slane %v333_v44, 4  ;;  %s348_s11 = scalar_lea.sflag [#allocation5], %s913_s8  ;;  %s648_s12 = scalar_lea.vmem %s925_s5, 16 }
  0xbf   : > { %p649_p2 = scmp.ne.s32.totalorder %s925_s5, %s648_s12  ;;  %s767_s7 = smov [#allocation4]  }
  0xc0   : > { %v321_v47 = vrot.slane %v320_v45, 2  ;;  %v335_v48 = vadd.f32 %v334_v46, %v333_v44  ;;  %s652_s13 = sshll.u32 %s767_s7, 4  ;;  %s653_s13 = int_to_ptr.vmem [resolvable:$false] %s652_s13 }
  0xc1   : > { %p650_p3 = pnand %p649_p2, %p836_p4  ;;  %s654_s14 = scalar_lea.vmem %s653_s13, 32 }
  0xc2   : > { %v322_v49 = vadd.f32 %v321_v47, %v320_v45  ;;  %v336_v50 = vrot.slane %v335_v48, 2  ;;  %p655_p6 = scmp.lt.s32.totalorder %s925_s5, %s653_s13  ;;  %p656_p7 = scmp.lt.s32.totalorder %s654_s14, %s648_s12 }
  0xc3   : > { %p651_p5 = pneg %p650_p3 }
  0xc4   : > { %v337_v51 = vadd.f32 %v336_v50, %v335_v48  ;;  %v323_v52 = vrot.slane %v322_v49, 1  ;;  %p657_p9 = por %p656_p7, %p655_p6 }
  0xc6   : > { %v324_v54 = vadd.f32 %v323_v52, %v322_v49  ;;  %v338_v55 = vrot.slane %v337_v51, 1  ;;  %p658_p10 = pnand %p657_p9, %p651_p5 }
  0xc8   : > { %v325_v57 = vadd.f32 %v324_v54, %v314_v53  ;;  %v339_v58 = vadd.f32 %v338_v55, %v337_v51 }
  0xca   : > { %327 = vst.msk [vmem:[%s862_s9] sm:$0x1] %vm247_vm0, %v325_v57  ;;  %v340_v59 = vadd.f32 %v339_v58, %v328_v56 }
  0xcb   : > { %661 = shalt.err (!%p658_p10)
}
  0xcc   : > { %s662_s9 = scalar_lea.hbm %s923_s29, 16  ;;  %s666_s18 = scalar_lea.hbm %s1012_s3, 32 }
  0xcd   : > { %p663_p11 = scmp.ne.s32.totalorder %s923_s29, %s662_s9  ;;  %p667_p0 = scmp.lt.u32.totalorder %s923_s29, %s1012_s3 }
  0xce   : > { %p668_p1 = scmp.lt.u32.totalorder %s666_s18, %s662_s9  ;;  %p670_p3 = scmp.lt.u32.totalorder %s662_s9, %s923_s29 }
  0xcf   : > { %p664_p12 = pnand %p663_p11, %p836_p4 }
  0xd0   : > { %p669_p2 = por %p668_p1, %p667_p0 }
  0xd1   : > { %p665_p13 = pneg %p664_p12 }
  0xd2   : > { %p671_p5 = por %p670_p3, %p669_p2 }
  0xd4   : > { %p672_p6 = pnand %p671_p5, %p665_p13 }
  0xd6   : > { %675 = shalt.err (!%p672_p6)
}
  0xd7   : > { %546 = dma.vmem_to_hbm [thread:$0]  (%p836_p4), %s925_s5, 16, %s923_s29, %s348_s11   ;;  %341 = vst.msk [vmem:[%s867_s10] sm:$0x1] %vm247_vm0, %v340_v59 }
  0xd8   : > { %s676_s12 = scalar_lea.vmem %s934_s6, 16  ;;  %s768_s13 = smov [#allocation6]  }
  0xd9   : > { %p677_p7 = scmp.ne.s32.totalorder %s934_s6, %s676_s12  ;;  %s680_s14 = sshll.u32 %s768_s13, 4  ;;  %s681_s14 = int_to_ptr.vmem [resolvable:$false] %s680_s14 }
  0xda   : > { %s682_s9 = scalar_lea.vmem %s681_s14, 32  ;;  %p683_p11 = scmp.lt.s32.totalorder %s934_s6, %s681_s14 }
  0xdb   : > { %p678_p9 = pnand %p677_p7, %p836_p4  ;;  %p684_p12 = scmp.lt.s32.totalorder %s682_s9, %s676_s12 }
  0xdd   : > { %p679_p10 = pneg %p678_p9  ;;  %p685_p13 = por %p684_p12, %p683_p11 }
  0xdf   : > { %p686_p0 = pnand %p685_p13, %p679_p10 }
  0xe1   : > { %689 = shalt.err (!%p686_p0)
}
  0xe2   : > { %s690_s10 = scalar_lea.hbm %s932_s30, 16  ;;  %s694_s26 = scalar_lea.hbm %s1013_s4, 32 }
  0xe3   : > { %p691_p1 = scmp.ne.s32.totalorder %s932_s30, %s690_s10  ;;  %p695_p5 = scmp.lt.u32.totalorder %s932_s30, %s1013_s4 }
  0xe4   : > { %p696_p6 = scmp.lt.u32.totalorder %s694_s26, %s690_s10  ;;  %p698_p9 = scmp.lt.u32.totalorder %s690_s10, %s932_s30 }
  0xe5   : > { %p692_p2 = pnand %p691_p1, %p836_p4 }
  0xe6   : > { %p697_p7 = por %p696_p6, %p695_p5 }
  0xe7   : > { %p693_p3 = pneg %p692_p2 }
  0xe8   : > { %p699_p10 = por %p698_p9, %p697_p7 }
  0xea   : > { %p700_p11 = pnand %p699_p10, %p693_p3 }
  0xec   : > { %703 = shalt.err (!%p700_p11)
}
  0xed   : > { %547 = dma.vmem_to_hbm [thread:$0]  (%p836_p4), %s934_s6, 16, %s932_s30, %s348_s11  }
  0xee PF: > { %p561_p12 = scmp.ge.s32.totalorder %s758_s20, 2  ;;  %s407_s21 = sand.u32 1, %s738_s15  }
  0xef   : > { %s408_s7 = scalar_lea.sflag [#allocation3], %s407_s21 }
  0xf0   : > { %p552_p13 = pnand %p561_p12, %p845_p8 }
  0xf2   : > { %729 = dma.done.wait (!%p552_p13), %s408_s7, 128  }
  0xf3   : > { %731 = vsyncadd (!%p552_p13), %s408_s7, 4294967168  ;;  %s416_s12 = sand.u32 1, %s525_s22  }
  0xf4   : > { %s417_s25 = scalar_lea.sflag [#allocation5], %s416_s12 }
  0xf5   : > { %733 = dma.done.wait (!%p552_p13), %s417_s25, 32  }
  0xf6   : > { %735 = vsyncadd (!%p552_p13), %s417_s25, 4294967264  ;;  %s21_s20 = sadd.s32 1, %s758_s20   ;;  %s1016_s15 = smov %s742_s16 }
  0xf7   : > { %p18_p4 = scmp.ge.s32.totalorder %s21_s20, 4   ;;  %s1017_s16 = smov %s746_s17 }
  0xf8   : > { %s1018_s17 = smov %s851_s28  ;;  %s1019_s18 = smov %s754_s19 }
  0xf9   : > { %s1020_s19 = smov %s1022_s23  ;;  %20 = sbr.rel (!%p18_p4) target bundleno = 6 (0x6), region = 99 }
 0x100   :  { %429 = vsyncpa [#allocation3], 1 }
 0x101   :  { %431 = vsyncpa [#allocation3 + $0x1], 1 }
 0x102   :  { %432 = vsyncpa [#allocation5], 1 }
 0x103   :  { %434 = vsyncpa [#allocation5 + $0x1], 1 }

</bundles_post_ra>
